<compile_context>
chip_gen: v7x
topology: tpu7x:2x2x1
jax: 0.10.0
libtpu: 0.0.40
codegen_flags: <defaults>
</compile_context>

<pallas_src>
import math

import jax
import jax.numpy as jnp
import numpy as np
from jax.experimental import pallas as pl
from jax.experimental.pallas import tpu as pltpu

_NEG_BIG = -1e30  # finite "minus infinity" for padded-key bias


# ---------------------------------------------------------------------------
# Phase 1: Wh = h @ W (k-tiled) and fused attention projections s1, s2.
# ---------------------------------------------------------------------------
def _make_proj_kernel(mxu_dtype, wh_dtype):
    def kernel(h_ref, w_ref, a12_ref, wh_ref, s12_ref, acc_ref):
        k = pl.program_id(1)

        @pl.when(k == 0)
        def _():
            acc_ref[...] = jnp.zeros_like(acc_ref)

        acc_ref[...] += jnp.dot(h_ref[...].astype(mxu_dtype),
                                w_ref[...].astype(mxu_dtype),
                                preferred_element_type=jnp.float32)

        @pl.when(k == pl.num_programs(1) - 1)
        def _():
            acc = acc_ref[...]
            wh_ref[...] = acc.astype(wh_dtype)
            # s12 stays f32 (tiny (Fpad,2) RHS); it feeds the exact row-max
            # precomputation in the wrapper.
            s12_ref[...] = jnp.dot(acc, a12_ref[...],
                                   preferred_element_type=jnp.float32)

    return kernel


# ---------------------------------------------------------------------------
# Phase 2: tiled attention; exact precomputed row max (no online-max rescale).
# ---------------------------------------------------------------------------
def _make_attn_kernel(alpha, tile_j, mxu_dtype, wh_resident):
    def kernel(s1_ref, s2_ref, m_ref, wh_ref, out_ref, l_sc, acc_sc):
        j = pl.program_id(1)

        @pl.when(j == 0)
        def _():
            l_sc[...] = jnp.zeros_like(l_sc)
            acc_sc[...] = jnp.zeros_like(acc_sc)

        # Logits for this (Ti,Tj) tile.  s2 already carries the -1e30 bias on
        # padded key columns, so no mask logic in the hot loop.
        e = s1_ref[...] + s2_ref[...]              # (Ti,1)+(1,Tj) -> (Ti,Tj)
        e = jnp.where(e > 0, e, alpha * e)         # LeakyReLU, f32 VPU
        p = jnp.exp(e - m_ref[...])                # exact max => p <= 1

        l_sc[...] += jnp.sum(p, axis=-1, keepdims=True)

        if wh_resident:
            start = pl.multiple_of(j * tile_j, tile_j)
            wh_blk = wh_ref[pl.ds(start, tile_j), :]
        else:
            wh_blk = wh_ref[...]

        acc_sc[...] += jnp.dot(p.astype(mxu_dtype), wh_blk,
                               preferred_element_type=jnp.float32)

        @pl.when(j == pl.num_programs(1) - 1)
        def _():
            out_ref[...] = (acc_sc[...]
                            * pl.reciprocal(l_sc[...], approx=True)
                            ).astype(out_ref.dtype)

    return kernel


# ---------------------------------------------------------------------------
# Wrapper
# ---------------------------------------------------------------------------
def gat_forward_pallas(h, W, a, alpha=0.2, *,
                       tile_i=256, tile_j=256, max_k_tile=512,
                       mxu_dtype=jnp.float32,
                       max_resident_wh_bytes=16 * 1024 * 1024):
    """GAT forward (adj=None, eval mode). h:(N,Fin) W:(Fin,Fout) a:(2*Fout,1)."""
    N, Fin = h.shape
    Fout = W.shape[1]
    f32 = jnp.float32
    mxu_dtype = jnp.dtype(mxu_dtype)
    wh_dtype = mxu_dtype                      # bf16 path stores Wh in bf16
    wh_isize = jnp.dtype(wh_dtype).itemsize

    Fpad = pl.cdiv(Fout, 128) * 128           # lane-dense Wh / output slab
    node_tile = math.lcm(tile_i, tile_j)
    Npad = pl.cdiv(N, node_tile) * node_tile
    n_i = Npad // tile_i
    n_j = Npad // tile_j

    # Contraction (Fin) tiling for Phase 1: bounded VMEM for large Fin.
    if Fin <= max_k_tile:
        tk, Fin_pad = Fin, Fin
    else:
        tk = max_k_tile
        Fin_pad = pl.cdiv(Fin, tk) * tk
    n_k = Fin_pad // tk

    # Zero padding: padded feature columns contribute 0 to every dot product;
    # padded key columns get a -1e30 bias; padded query rows are sliced off.
    h_pad = jnp.pad(h.astype(f32), ((0, Npad - N), (0, Fin_pad - Fin)))
    W_pad = jnp.pad(W.astype(f32), ((0, Fin_pad - Fin), (0, Fpad - Fout)))
    a12 = jnp.concatenate([a[:Fout, :], a[Fout:, :]], axis=1).astype(f32)
    a12_pad = jnp.pad(a12, ((0, Fpad - Fout), (0, 0)))            # (Fpad, 2)

    # --- Phase 1: projections, hoisted out of the (i, j) attention loop. ---
    p1_budget = (2 * tile_i * tk * 4          # h blocks (double-buffered)
                 + 2 * tk * Fpad * 4          # W blocks
                 + 2 * Fpad * 128 * 4         # a12 (lane-padded)
                 + 2 * tile_i * Fpad * wh_isize   # wh out blocks
                 + 2 * tile_i * 128 * 4       # s12 out blocks (lane-padded)
                 + tile_i * Fpad * 4          # f32 accumulator scratch
                 + (2 << 20))
    p1_vmem = int(min(max(p1_budget, 32 << 20), 96 << 20))

    wh, s12 = pl.pallas_call(
        _make_proj_kernel(mxu_dtype, wh_dtype),
        out_shape=(jax.ShapeDtypeStruct((Npad, Fpad), wh_dtype),
                   jax.ShapeDtypeStruct((Npad, 2), f32)),
        grid_spec=pltpu.PrefetchScalarGridSpec(
            num_scalar_prefetch=0,
            grid=(n_i, n_k),
            in_specs=[pl.BlockSpec((tile_i, tk), lambda i, k: (i, k)),
                      pl.BlockSpec((tk, Fpad), lambda i, k: (k, 0)),
                      pl.BlockSpec((Fpad, 2), lambda i, k: (0, 0))],
            out_specs=[pl.BlockSpec((tile_i, Fpad), lambda i, k: (i, 0)),
                       pl.BlockSpec((tile_i, 2), lambda i, k: (i, 0))],
            scratch_shapes=[pltpu.VMEM((tile_i, Fpad), f32)]),
        compiler_params=pltpu.CompilerParams(
            dimension_semantics=("parallel", "arbitrary"),
            vmem_limit_bytes=p1_vmem),
    )(h_pad, W_pad, a12_pad)

    # Wrapper-side layout plumbing (tiny XLA ops, outside the hot loop).
    s1_col = s12[:, 0:1]                                          # (Npad, 1)
    s2 = s12[:, 1]                                                # (Npad,)
    # Exact per-row softmax max: logits are rank-1 through a monotone LeakyReLU.
    s2_max = jnp.max(s2[:N])
    z = s1_col + s2_max
    m_col = jnp.where(z > 0, z, alpha * z)                        # (Npad, 1)
    # Fold padded-key masking into an additive bias on s2 (f32; exp -> 0).
    col_valid = jnp.arange(Npad) < N
    s2_row = (s2 + jnp.where(col_valid, 0.0, _NEG_BIG))[None, :]  # (1, Npad)

    # --- Phase 2: (i, j)-tiled attention with precomputed row max. ---------
    wh_bytes = Npad * Fpad * wh_isize
    wh_resident = wh_bytes <= max_resident_wh_bytes
    if wh_resident:
        # Constant block index => DMA'd into VMEM once, sliced per j-tile.
        wh_spec = pl.BlockSpec((Npad, Fpad), lambda i, j: (0, 0))
        wh_vmem = 2 * wh_bytes                # conservative (v7x: 64 MiB VMEM)
    else:
        wh_spec = pl.BlockSpec((tile_j, Fpad), lambda i, j: (j, 0))
        wh_vmem = 2 * tile_j * Fpad * wh_isize

    p2_budget = (wh_vmem
                 + 2 * tile_i * Fpad * 4      # out blocks
                 + tile_i * Fpad * 4          # accumulator scratch
                 + 4 * tile_i * 128 * 4       # s1 + m blocks (lane-padded)
                 + 2 * 8 * tile_j * 4         # s2 row blocks
                 + tile_i * 128 * 4           # denom scratch
                 + (2 << 20))
    p2_vmem = int(min(max(p2_budget, 32 << 20), 96 << 20))

    out = pl.pallas_call(
        _make_attn_kernel(alpha, tile_j, mxu_dtype, wh_resident),
        out_shape=jax.ShapeDtypeStruct((Npad, Fpad), f32),
        grid_spec=pltpu.PrefetchScalarGridSpec(
            num_scalar_prefetch=0,
            grid=(n_i, n_j),
            in_specs=[pl.BlockSpec((tile_i, 1), lambda i, j: (i, 0)),
                      pl.BlockSpec((1, tile_j), lambda i, j: (0, j)),
                      pl.BlockSpec((tile_i, 1), lambda i, j: (i, 0)),
                      wh_spec],
            out_specs=pl.BlockSpec((tile_i, Fpad), lambda i, j: (i, 0)),
            scratch_shapes=[pltpu.VMEM((tile_i, 1), f32),        # denom
                            pltpu.VMEM((tile_i, Fpad), f32)]),   # accumulator
        compiler_params=pltpu.CompilerParams(
            # TODO(synk): on v7x verify the i axis shards across both
            # TensorCores; switch to pltpu.CORE_PARALLEL if it does not.
            dimension_semantics=("parallel", "arbitrary"),
            vmem_limit_bytes=p2_vmem),
    )(s1_col, s2_row, m_col, wh)

    return out[:N, :Fout]


# ---------------------------------------------------------------------------
# Pure-JAX reference (mirrors the PyTorch forward, adj=None, eval mode).
# ---------------------------------------------------------------------------
def gat_forward_ref(h, W, a, alpha=0.2):
    Wh = h @ W
    Fout = W.shape[1]
    e = Wh @ a[:Fout, :] + (Wh @ a[Fout:, :]).T
    e = jnp.where(e > 0, e, alpha * e)
    attn = jax.nn.softmax(e, axis=1)
    return attn @ Wh


def xavier_uniform(key, shape, dtype=jnp.float32):
    fan_in, fan_out = shape[0], shape[1]
    bound = float(np.sqrt(6.0 / (fan_in + fan_out)))
    return jax.random.uniform(key, shape, dtype, minval=-bound, maxval=bound)


if __name__ == "__main__":
    alpha = 0.2
    key = jax.random.PRNGKey(0)
    k_h, k_w, k_a, k_h2, k_w2, k_a2 = jax.random.split(key, 6)

    # --- small config matching the module defaults (resident-Wh path) ------
    in_features, out_features, n_nodes = 32, 16, 8
    h = jax.random.normal(k_h, (n_nodes, in_features), dtype=jnp.float32)
    W = xavier_uniform(k_w, (in_features, out_features))
    a = xavier_uniform(k_a, (2 * out_features, 1))

    ref = jax.block_until_ready(gat_forward_ref(h, W, a, alpha=alpha))

    out = jax.block_until_ready(gat_forward_pallas(h, W, a, alpha=alpha))
    np.testing.assert_allclose(np.asarray(out), np.asarray(ref),
                               rtol=2e-2, atol=1e-3)

    # bf16 MXU fast path (v6e/v7x): bf16 Wh storage + bf16 MXU operands,
    # f32 VPU/EUP softmax math (v5e-safe) and f32 accumulation.
    out_bf16 = jax.block_until_ready(
        gat_forward_pallas(h, W, a, alpha=alpha, mxu_dtype=jnp.bfloat16))
    np.testing.assert_allclose(np.asarray(out_bf16), np.asarray(ref),
                               rtol=5e-2, atol=5e-2)

    # --- multi-tile / streaming-Wh / padded-key-column path ----------------
    n2, fin2, fout2 = 300, 48, 24
    h2 = jax.random.normal(k_h2, (n2, fin2), dtype=jnp.float32)
    W2 = xavier_uniform(k_w2, (fin2, fout2))
    a2 = xavier_uniform(k_a2, (2 * fout2, 1))

    ref2 = jax.block_until_ready(gat_forward_ref(h2, W2, a2, alpha=alpha))
    out2 = jax.block_until_ready(
        gat_forward_pallas(h2, W2, a2, alpha=alpha,
                           tile_i=128, tile_j=128,
                           max_resident_wh_bytes=0))   # force streaming path
    np.testing.assert_allclose(np.asarray(out2), np.asarray(ref2),
                               rtol=2e-2, atol=2e-3)

    print("KERNEL_OK")
</pallas_src>

<mosaic_0001>
module attributes {stable_mosaic.version = 11 : i64} {
  func.func @kernel(%arg0: i32, %arg1: i32, %arg2: memref<256x32xf32, #tpu.memory_space<vmem>>, %arg3: memref<32x128xf32, #tpu.memory_space<vmem>>, %arg4: memref<128x2xf32, #tpu.memory_space<vmem>>, %arg5: memref<256x128xf32, #tpu.memory_space<vmem>>, %arg6: memref<256x2xf32, #tpu.memory_space<vmem>>, %arg7: memref<256x128xf32, #tpu.memory_space<vmem>>) attributes {dimension_semantics = [#tpu.dimension_semantics<parallel>, #tpu.dimension_semantics<arbitrary>], iteration_bounds = array<i64: 1, 1>, scalar_prefetch = 0 : i64, scratch_operands = 1 : i64, tpu.core_type = #tpu.core_type<tc>, window_params = [{transform_indices = @transform_0, window_bounds = array<i64: 256, 32>}, {transform_indices = @transform_1, window_bounds = array<i64: 32, 128>}, {pipeline_mode = #tpu.pipeline_mode<synchronous>, transform_indices = @transform_2, window_bounds = array<i64: 128, 2>}, {transform_indices = @transform_3, window_bounds = array<i64: 256, 128>}, {transform_indices = @transform_4, window_bounds = array<i64: 256, 2>}]} {
    %c0_i32 = arith.constant 0 : i32
    %0 = arith.cmpi eq, %arg1, %c0_i32 : i32
    %1 = arith.extui %0 : i1 to i32
    %c0_i32_0 = arith.constant 0 : i32
    %2 = arith.cmpi ne, %1, %c0_i32_0 : i32
    scf.if %2 {
      %cst_10 = arith.constant 0.000000e+00 : f32
      %12 = vector.broadcast %cst_10 : f32 to vector<256x128xf32>
      %c0_11 = arith.constant 0 : index
      %c0_12 = arith.constant 0 : index
      %13 = vector.load %arg7[%c0_11, %c0_12] : memref<256x128xf32, #tpu.memory_space<vmem>>, vector<256x128xf32>
      tpu.vector_store %arg7[%c0_11, %c0_12], %12 {strides = array<i32>} : memref<256x128xf32, #tpu.memory_space<vmem>>, vector<256x128xf32>,
    } else {
    }
    %c0 = arith.constant 0 : index
    %c0_1 = arith.constant 0 : index
    %3 = vector.load %arg7[%c0, %c0_1] : memref<256x128xf32, #tpu.memory_space<vmem>>, vector<256x128xf32>
    %c0_2 = arith.constant 0 : index
    %c0_3 = arith.constant 0 : index
    %4 = vector.load %arg2[%c0_2, %c0_3] : memref<256x32xf32, #tpu.memory_space<vmem>>, vector<256x32xf32>
    %c0_4 = arith.constant 0 : index
    %c0_5 = arith.constant 0 : index
    %5 = vector.load %arg3[%c0_4, %c0_5] : memref<32x128xf32, #tpu.memory_space<vmem>>, vector<32x128xf32>
    %cst = arith.constant dense<0.000000e+00> : vector<256x128xf32>
    %6 = tpu.matmul %4, %5, %cst {dimension_numbers = #tpu.dot_dimension_numbers<[1], [0], [0], [1], [0, 0, 1, 1], [], []>} : vector<256x32xf32>, vector<32x128xf32>, vector<256x128xf32> -> vector<256x128xf32>
    %7 = arith.addf %3, %6 : vector<256x128xf32>
    %c0_6 = arith.constant 0 : index
    %c0_7 = arith.constant 0 : index
    %8 = vector.load %arg7[%c0_6, %c0_7] : memref<256x128xf32, #tpu.memory_space<vmem>>, vector<256x128xf32>
    tpu.vector_store %arg7[%c0_6, %c0_7], %7 {strides = array<i32>} : memref<256x128xf32, #tpu.memory_space<vmem>>, vector<256x128xf32>,
    %c0_i32_8 = arith.constant 0 : i32
    %9 = arith.cmpi eq, %arg1, %c0_i32_8 : i32
    %10 = arith.extui %9 : i1 to i32
    %c0_i32_9 = arith.constant 0 : i32
    %11 = arith.cmpi ne, %10, %c0_i32_9 : i32
    scf.if %11 {
      %c0_10 = arith.constant 0 : index
      %c0_11 = arith.constant 0 : index
      %12 = vector.load %arg7[%c0_10, %c0_11] : memref<256x128xf32, #tpu.memory_space<vmem>>, vector<256x128xf32>
      %c0_12 = arith.constant 0 : index
      %c0_13 = arith.constant 0 : index
      %13 = vector.load %arg5[%c0_12, %c0_13] : memref<256x128xf32, #tpu.memory_space<vmem>>, vector<256x128xf32>
      tpu.vector_store %arg5[%c0_12, %c0_13], %12 {strides = array<i32>} : memref<256x128xf32, #tpu.memory_space<vmem>>, vector<256x128xf32>,
      %c0_14 = arith.constant 0 : index
      %c0_15 = arith.constant 0 : index
      %14 = vector.load %arg4[%c0_14, %c0_15] : memref<128x2xf32, #tpu.memory_space<vmem>>, vector<128x2xf32>
      %cst_16 = arith.constant dense<0.000000e+00> : vector<256x2xf32>
      %15 = tpu.matmul %12, %14, %cst_16 {dimension_numbers = #tpu.dot_dimension_numbers<[1], [0], [0], [1], [0, 0, 1, 1], [], []>} : vector<256x128xf32>, vector<128x2xf32>, vector<256x2xf32> -> vector<256x2xf32>
      %c0_17 = arith.constant 0 : index
      %c0_18 = arith.constant 0 : index
      %16 = vector.load %arg6[%c0_17, %c0_18] : memref<256x2xf32, #tpu.memory_space<vmem>>, vector<256x2xf32>
      tpu.vector_store %arg6[%c0_17, %c0_18], %15 {strides = array<i32>} : memref<256x2xf32, #tpu.memory_space<vmem>>, vector<256x2xf32>,
    } else {
    }
    return
  }
  func.func @transform_0(%arg0: i32, %arg1: i32) -> (i32, i32) {
    %c0_i32 = arith.constant 0 : i32
    return %arg0, %arg1 : i32, i32
  }
  func.func @transform_1(%arg0: i32, %arg1: i32) -> (i32, i32) {
    %c0_i32 = arith.constant 0 : i32
    %c0_i32_0 = arith.constant 0 : i32
    return %arg1, %c0_i32 : i32, i32
  }
  func.func @transform_2(%arg0: i32, %arg1: i32) -> (i32, i32) {
    %c0_i32 = arith.constant 0 : i32
    %c0_i32_0 = arith.constant 0 : i32
    %c0_i32_1 = arith.constant 0 : i32
    return %c0_i32, %c0_i32_0 : i32, i32
  }
  func.func @transform_3(%arg0: i32, %arg1: i32) -> (i32, i32) {
    %c0_i32 = arith.constant 0 : i32
    %c0_i32_0 = arith.constant 0 : i32
    return %arg0, %c0_i32 : i32, i32
  }
  func.func @transform_4(%arg0: i32, %arg1: i32) -> (i32, i32) {
    %c0_i32 = arith.constant 0 : i32
    %c0_i32_0 = arith.constant 0 : i32
    return %arg0, %c0_i32 : i32, i32
  }
}

</mosaic_0001>

<bundles_post_ra>
// kernel: tpu_custom_call.1
= control target key start
LH: loop header
LB: loop body
LE: loop exit
PB: predicated region body
PF: predicated region fallthrough
CT: control target
= control target key end

     0   :  { %vm121_vm0 = vcmask 261120   ;;  %s1559_s0 = inlined_call_operand.vmem [shape: f32[256,32], index: 0, kind: input, shape index: {}]   ;;  %s1560_s1 = inlined_call_operand.vmem [shape: f32[32,128], index: 1, kind: input, shape index: {}]   ;;  %s1561_s2 = inlined_call_operand.vmem [shape: f32[128,2], index: 2, kind: input, shape index: {}]   ;;  %s1562_s3 = inlined_call_operand.hbm [shape: f32[256,128], index: 3, kind: output, shape index: {0}]   ;;  %s1563_s4 = inlined_call_operand.vmem [shape: f32[256,2], index: 4, kind: output, shape index: {1}]  }
   0x1   :  { %v117_v0 = vld [vmem:[%s1560_s1] sm:$0xff]  ;;  %v118_v1 = vld [vmem:[%s1560_s1 + $0x8] sm:$0xff]  ;;  %v119_v2 = vld [vmem:[%s1560_s1 + $0x10] sm:$0xff] }
   0x2   :  { %v1120_v3 = vpack.c.bf16 %v118_v1, %v117_v0  ;;  %v120_v4 = vld [vmem:[%s1560_s1 + $0x18] sm:$0xff]  ;;  %v85_v5 = vld [vmem:[%s1559_s0] sm:$0xff]  ;;  %v86_v7 = vld [vmem:[%s1559_s0 + $0x8] sm:$0xff] }
   0x3   :  { %v1124_v6 = vpack.c.bf16 %v120_v4, %v119_v2  ;;  %992 = vmatprep.mubr.msk.f32.mxu0 %vm121_vm0, %v85_v5  ;;  %v87_v8 = vld [vmem:[%s1559_s0 + $0x10] sm:$0xff]  ;;  %v88_v9 = vld [vmem:[%s1559_s0 + $0x18] sm:$0xff]  ;;  %v574_v10 = vld [vmem:[%s1561_s2] sm:$0xff] }
   0x4   :  { %1121 = vmatprep.subr.bf16.mxu0 %v1120_v3  ;;  %v575_v11 = vld [vmem:[%s1561_s2 + $0x8] sm:$0xff]  ;;  %v576_v12 = vld [vmem:[%s1561_s2 + $0x10] sm:$0xff]  ;;  %v89_v13 = vld [vmem:[%s1559_s0 + $0x20] sm:$0xff] }
   0x5   :  { %1123 = vmatpush3.bf16.msra.mxu0 %v1120_v3  ;;  %v1128_v14 = vpack.c.bf16 %v575_v11, %v574_v10  ;;  %v577_v15 = vld [vmem:[%s1561_s2 + $0x18] sm:$0xff]  ;;  %v578_v17 = vld [vmem:[%s1561_s2 + $0x20] sm:$0xff]  ;;  %v579_v18 = vld [vmem:[%s1561_s2 + $0x28] sm:$0xff] }
   0x6   :  { %1125 = vmatprep.subr.bf16.mxu0 %v1124_v6  ;;  %v1132_v16 = vpack.c.bf16 %v577_v15, %v576_v12  ;;  %v90_v19 = vld [vmem:[%s1559_s0 + $0x28] sm:$0xff]  ;;  %v91_v20 = vld [vmem:[%s1559_s0 + $0x30] sm:$0xff]  ;;  %v1136_v21 = vpack.c.bf16 %v579_v18, %v578_v17 }
   0x7   :  { %1160 = vmatprep.subr.bf16.mxu1 %v1128_v14 }
   0x9   :  { %1127 = vmatpush3.bf16.msra.mxu0 %v1124_v6 }
   0xa   :  { %1129 = vmatprep.subr.bf16.mxu0 %v1128_v14 }
   0xc   :  { %993 = vmatmul.mubr.msk.f32.vlgmr.msra.gmra.mrb[0].mxu0 %vm121_vm0, %v86_v7 }
   0xd   :  { %995 = vmatprep.mubr.msk.f32.mxu0 %vm121_vm0, %v87_v8  ;;  %1131 = vmatpush3.bf16.msra.mxu0 %v1128_v14 }
   0xe   :  { %1133 = vmatprep.subr.bf16.mxu0 %v1132_v16 }
  0x10   :  { %996 = vmatmul.mubr.msk.f32.gmra.mrb[2].mxu0 %vm121_vm0, %v88_v9 }
  0x11   :  { %998 = vmatprep.mubr.msk.f32.mxu0 %vm121_vm0, %v89_v13 }
  0x12   :  { %10 = vsyncpa [#allocation4], 0  ;;  %v580_v22 = vld [vmem:[%s1561_s2 + $0x30] sm:$0xff]  ;;  %v581_v23 = vld [vmem:[%s1561_s2 + $0x38] sm:$0xff]  ;;  %1168 = vmatpush3.bf16.msra.mxu1 %v1128_v14  ;;  %1135 = vmatpush3.bf16.msra.mxu0 %v1132_v16 }
  0x13   :  { %1161 = vmatprep.subr.bf16.mxu1 %v1132_v16  ;;  %v92_v24 = vld [vmem:[%s1559_s0 + $0x38] sm:$0xff]  ;;  %v93_v25 = vld [vmem:[%s1559_s0 + $0x40] sm:$0xff]  ;;  %1137 = vmatprep.subr.bf16.mxu0 %v1136_v21  ;;  %v1140_v26 = vpack.c.bf16 %v581_v23, %v580_v22  ;;  %v583_v28 = vld [vmem:[%s1561_s2 + $0x48] sm:$0xff] }
  0x14   :  { %999 = vmatmul.mubr.msk.f32.gmra.mrb[4].mxu0 %vm121_vm0, %v90_v19  ;;  %v582_v27 = vld [vmem:[%s1561_s2 + $0x40] sm:$0xff]  ;;  %v94_v29 = vld [vmem:[%s1559_s0 + $0x48] sm:$0xff]  ;;  %v95_v30 = vld [vmem:[%s1559_s0 + $0x50] sm:$0xff] }
  0x15   :  { %1001 = vmatprep.mubr.msk.f32.mxu0 %vm121_vm0, %v91_v20  ;;  %v1144_v31 = vpack.c.bf16 %v583_v28, %v582_v27  ;;  %v584_v32 = vld [vmem:[%s1561_s2 + $0x50] sm:$0xff]  ;;  %v585_v33 = vld [vmem:[%s1561_s2 + $0x58] sm:$0xff]  ;;  %v97_v35 = vld [vmem:[%s1559_s0 + $0x60] sm:$0xff] }
  0x16   :  { %1169 = vmatpush3.bf16.msra.mxu1 %v1132_v16  ;;  %1139 = vmatpush3.bf16.msra.mxu0 %v1136_v21  ;;  %v96_v34 = vld [vmem:[%s1559_s0 + $0x58] sm:$0xff]  ;;  %v1148_v36 = vpack.c.bf16 %v585_v33, %v584_v32  ;;  %v586_v37 = vld [vmem:[%s1561_s2 + $0x60] sm:$0xff]  ;;  %v587_v38 = vld [vmem:[%s1561_s2 + $0x68] sm:$0xff] }
  0x17   :  { %1162 = vmatprep.subr.bf16.mxu1 %v1136_v21  ;;  %1141 = vmatprep.subr.bf16.mxu0 %v1140_v26  ;;  %v98_v39 = vld [vmem:[%s1559_s0 + $0x68] sm:$0xff]  ;;  %v99_v40 = vld [vmem:[%s1559_s0 + $0x70] sm:$0xff]  ;;  %v1152_v41 = vpack.c.bf16 %v587_v38, %v586_v37  ;;  %v589_v43 = vld [vmem:[%s1561_s2 + $0x78] sm:$0xff] }
  0x18   :  { %1002 = vmatmul.mubr.msk.f32.gmra.mrb[6].mxu0 %vm121_vm0, %v92_v24  ;;  %v588_v42 = vld [vmem:[%s1561_s2 + $0x70] sm:$0xff]  ;;  %v100_v44 = vld [vmem:[%s1559_s0 + $0x78] sm:$0xff]  ;;  %v101_v45 = vld [vmem:[%s1559_s0 + $0x80] sm:$0xff] }
  0x19   :  { %1004 = vmatprep.mubr.msk.f32.mxu0 %vm121_vm0, %v93_v25  ;;  %v1156_v46 = vpack.c.bf16 %v589_v43, %v588_v42  ;;  %v102_v47 = vld [vmem:[%s1559_s0 + $0x88] sm:$0xff]  ;;  %v103_v48 = vld [vmem:[%s1559_s0 + $0x90] sm:$0xff]  ;;  %v104_v49 = vld [vmem:[%s1559_s0 + $0x98] sm:$0xff] }
  0x1a   :  { %1170 = vmatpush3.bf16.msra.mxu1 %v1136_v21  ;;  %1143 = vmatpush3.bf16.msra.mxu0 %v1140_v26  ;;  %v105_v50 = vld [vmem:[%s1559_s0 + $0xa0] sm:$0xff]  ;;  %v106_v51 = vld [vmem:[%s1559_s0 + $0xa8] sm:$0xff]  ;;  %v107_v52 = vld [vmem:[%s1559_s0 + $0xb0] sm:$0xff] }
  0x1b   :  { %1163 = vmatprep.subr.bf16.mxu1 %v1140_v26  ;;  %1145 = vmatprep.subr.bf16.mxu0 %v1144_v31  ;;  %v108_v53 = vld [vmem:[%s1559_s0 + $0xb8] sm:$0xff]  ;;  %v109_v54 = vld [vmem:[%s1559_s0 + $0xc0] sm:$0xff]  ;;  %v110_v55 = vld [vmem:[%s1559_s0 + $0xc8] sm:$0xff] }
  0x1c   :  { %1005 = vmatmul.mubr.msk.f32.gmra.mrb[8].mxu0 %vm121_vm0, %v94_v29  ;;  %v111_v56 = vld [vmem:[%s1559_s0 + $0xd0] sm:$0xff]  ;;  %v112_v57 = vld [vmem:[%s1559_s0 + $0xd8] sm:$0xff]  ;;  %v113_v58 = vld [vmem:[%s1559_s0 + $0xe0] sm:$0xff] }
  0x1d   :  { %1007 = vmatprep.mubr.msk.f32.mxu0 %vm121_vm0, %v95_v30  ;;  %v114_v59 = vld [vmem:[%s1559_s0 + $0xe8] sm:$0xff]  ;;  %v115_v60 = vld [vmem:[%s1559_s0 + $0xf0] sm:$0xff]  ;;  %v116_v61 = vld [vmem:[%s1559_s0 + $0xf8] sm:$0xff]  ;;  %s1203_s0 = smov [#allocation3]  }
  0x1e   :  { %1171 = vmatpush3.bf16.msra.mxu1 %v1140_v26  ;;  %1147 = vmatpush3.bf16.msra.mxu0 %v1144_v31  ;;  %s853_s9 = sshll.u32 %s1203_s0, 4  ;;  %s854_s9 = int_to_ptr.vmem [resolvable:$true] %s853_s9 }
  0x1f   :  { %1164 = vmatprep.subr.bf16.mxu1 %v1144_v31  ;;  %1149 = vmatprep.subr.bf16.mxu0 %v1148_v36  ;;  %s1179_s10 = scalar_lea.vmem %s854_s9, 4096  ;;  %p1184_p1 = scmp.lt.s32.totalorder %s854_s9, %s854_s9 }
  0x20   :  { %1008 = vmatmul.mubr.msk.f32.gmra.mrb[10].mxu0 %vm121_vm0, %v96_v34  ;;  %p1180_p0 = scmp.ne.s32.totalorder %s854_s9, %s1179_s10  ;;  %p1185_p2 = scmp.lt.s32.totalorder %s1179_s10, %s1179_s10 }
  0x21   :  { %1010 = vmatprep.mubr.msk.f32.mxu0 %vm121_vm0, %v97_v35 }
  0x22   :  { %1172 = vmatpush3.bf16.msra.mxu1 %v1144_v31  ;;  %1151 = vmatpush3.bf16.msra.mxu0 %v1148_v36  ;;  %p1186_p3 = por %p1185_p2, %p1184_p1 }
  0x23   :  { %1165 = vmatprep.subr.bf16.mxu1 %v1148_v36  ;;  %1153 = vmatprep.subr.bf16.mxu0 %v1152_v41 }
  0x24   :  { %1011 = vmatmul.mubr.msk.f32.gmra.mrb[12].mxu0 %vm121_vm0, %v98_v39  ;;  %p1187_p4 = pnand %p1186_p3, %p1180_p0 }
  0x25   :  { %1013 = vmatprep.mubr.msk.f32.mxu0 %vm121_vm0, %v99_v40 }
  0x26   :  { %1173 = vmatpush3.bf16.msra.mxu1 %v1148_v36  ;;  %1155 = vmatpush3.bf16.msra.mxu0 %v1152_v41 }
  0x27   :  { %1166 = vmatprep.subr.bf16.mxu1 %v1152_v41  ;;  %1157 = vmatprep.subr.bf16.mxu0 %v1156_v46 }
  0x28   :  { %1014 = vmatmul.mubr.msk.f32.gmra.mrb[14].mxu0 %vm121_vm0, %v100_v44 }
  0x29   :  { %1016 = vmatprep.mubr.msk.f32.mxu0 %vm121_vm0, %v101_v45 }
  0x2a   :  { %1174 = vmatpush3.bf16.msra.mxu1 %v1152_v41  ;;  %1159 = vmatpush3.bf16.msra.mxu0 %v1156_v46 }
  0x2b   :  { %1167 = vmatprep.subr.bf16.mxu1 %v1156_v46 }
  0x2c   :  { %1017 = vmatmul.mubr.msk.f32.gmra.mrb[16].mxu0 %vm121_vm0, %v102_v47 }
  0x2d   :  { %1019 = vmatprep.mubr.msk.f32.mxu0 %vm121_vm0, %v103_v48 }
  0x2e   :  { %1175 = vmatpush3.bf16.msra.mxu1 %v1156_v46 }
  0x30   :  { %1020 = vmatmul.mubr.msk.f32.gmra.mrb[18].mxu0 %vm121_vm0, %v104_v49 }
  0x31   :  { %1022 = vmatprep.mubr.msk.f32.mxu0 %vm121_vm0, %v105_v50 }
  0x34   :  { %1023 = vmatmul.mubr.msk.f32.gmra.mrb[20].mxu0 %vm121_vm0, %v106_v51 }
  0x35   :  { %1025 = vmatprep.mubr.msk.f32.mxu0 %vm121_vm0, %v107_v52 }
  0x38   :  { %1026 = vmatmul.mubr.msk.f32.gmra.mrb[22].mxu0 %vm121_vm0, %v108_v53 }
  0x39   :  { %1028 = vmatprep.mubr.msk.f32.mxu0 %vm121_vm0, %v109_v54 }
  0x3c   :  { %1029 = vmatmul.mubr.msk.f32.gmra.mrb[24].mxu0 %vm121_vm0, %v110_v55 }
  0x3d   :  { %1031 = vmatprep.mubr.msk.f32.mxu0 %vm121_vm0, %v111_v56 }
  0x40   :  { %1032 = vmatmul.mubr.msk.f32.gmra.mrb[26].mxu0 %vm121_vm0, %v112_v57 }
  0x41   :  { %1034 = vmatprep.mubr.msk.f32.mxu0 %vm121_vm0, %v113_v58 }
  0x44   :  { %1035 = vmatmul.mubr.msk.f32.gmra.mrb[28].mxu0 %vm121_vm0, %v114_v59 }
  0x45   :  { %1037 = vmatprep.mubr.msk.f32.mxu0 %vm121_vm0, %v115_v60 }
  0x48   :  { %1038 = vmatmul.mubr.msk.f32.gmra.mrb[30].mxu0 %vm121_vm0, %v116_v61 }
  0xdf   :  { %v994_v62 = vpop.f32.mrb[0].mxu0 }
  0xe0   :  { %543 = vst [vmem:[#allocation3 + $0x8] sm:$0xff] %v994_v62  ;;  %v284_v63 = vpop.f32.mrb[1].mxu0 }
  0xe1   :  { %542 = vst [vmem:[#allocation3] sm:$0xff] %v284_v63  ;;  %1072 = vmatprep.mubr.f32.mxu0 %v284_v63 }
  0xe2   :  { %1073 = vmatmul.mubr.f32.vlgmr.msra.gmra.mrb[32].mxu0 %v994_v62 }
  0xe3   :  { %v997_v0 = vpop.f32.mrb[2].mxu0 }
  0xe4   :  { %545 = vst [vmem:[#allocation3 + $0x18] sm:$0xff] %v997_v0  ;;  %v294_v1 = vpop.f32.mrb[3].mxu0 }
  0xe5   :  { %544 = vst [vmem:[#allocation3 + $0x10] sm:$0xff] %v294_v1  ;;  %1075 = vmatprep.mubr.f32.mxu0 %v294_v1 }
  0xe6   :  { %1076 = vmatmul.mubr.f32.gmra.mrb[34].mxu0 %v997_v0 }
  0xe7   :  { %v1000_v2 = vpop.f32.mrb[4].mxu0 }
  0xe8   :  { %547 = vst [vmem:[#allocation3 + $0x28] sm:$0xff] %v1000_v2  ;;  %v304_v3 = vpop.f32.mrb[5].mxu0 }
  0xe9   :  { %546 = vst [vmem:[#allocation3 + $0x20] sm:$0xff] %v304_v3  ;;  %1078 = vmatprep.mubr.f32.mxu0 %v304_v3 }
  0xea   :  { %1079 = vmatmul.mubr.f32.gmra.mrb[36].mxu0 %v1000_v2 }
  0xeb   :  { %v1003_v4 = vpop.f32.mrb[6].mxu0 }
  0xec   :  { %549 = vst [vmem:[#allocation3 + $0x38] sm:$0xff] %v1003_v4  ;;  %v314_v5 = vpop.f32.mrb[7].mxu0 }
  0xed   :  { %548 = vst [vmem:[#allocation3 + $0x30] sm:$0xff] %v314_v5  ;;  %1081 = vmatprep.mubr.f32.mxu1 %v314_v5 }
  0xee   :  { %1082 = vmatmul.mubr.f32.vlgmr.msra.gmra.mrb[0].mxu1 %v1003_v4 }
  0xef   :  { %v1006_v6 = vpop.f32.mrb[8].mxu0 }
  0xf0   :  { %551 = vst [vmem:[#allocation3 + $0x48] sm:$0xff] %v1006_v6  ;;  %v324_v7 = vpop.f32.mrb[9].mxu0 }
  0xf1   :  { %550 = vst [vmem:[#allocation3 + $0x40] sm:$0xff] %v324_v7  ;;  %1084 = vmatprep.mubr.f32.mxu1 %v324_v7 }
  0xf2   :  { %1085 = vmatmul.mubr.f32.gmra.mrb[2].mxu1 %v1006_v6 }
  0xf3   :  { %v1009_v8 = vpop.f32.mrb[10].mxu0 }
  0xf4   :  { %553 = vst [vmem:[#allocation3 + $0x58] sm:$0xff] %v1009_v8  ;;  %v334_v9 = vpop.f32.mrb[11].mxu0 }
  0xf5   :  { %552 = vst [vmem:[#allocation3 + $0x50] sm:$0xff] %v334_v9  ;;  %1087 = vmatprep.mubr.f32.mxu1 %v334_v9 }
  0xf6   :  { %1088 = vmatmul.mubr.f32.gmra.mrb[4].mxu1 %v1009_v8 }
  0xf7   :  { %v1012_v10 = vpop.f32.mrb[12].mxu0 }
  0xf8   :  { %555 = vst [vmem:[#allocation3 + $0x68] sm:$0xff] %v1012_v10  ;;  %v344_v11 = vpop.f32.mrb[13].mxu0 }
  0xf9   :  { %554 = vst [vmem:[#allocation3 + $0x60] sm:$0xff] %v344_v11  ;;  %1090 = vmatprep.mubr.f32.mxu1 %v344_v11 }
  0xfa   :  { %1091 = vmatmul.mubr.f32.gmra.mrb[6].mxu1 %v1012_v10 }
  0xfb   :  { %v1015_v12 = vpop.f32.mrb[14].mxu0 }
  0xfc   :  { %557 = vst [vmem:[#allocation3 + $0x78] sm:$0xff] %v1015_v12  ;;  %v354_v13 = vpop.f32.mrb[15].mxu0 }
  0xfd   :  { %556 = vst [vmem:[#allocation3 + $0x70] sm:$0xff] %v354_v13  ;;  %1093 = vmatprep.mubr.f32.mxu1 %v354_v13 }
  0xfe   :  { %1094 = vmatmul.mubr.f32.gmra.mrb[8].mxu1 %v1015_v12 }
  0xff   :  { %v1018_v14 = vpop.f32.mrb[16].mxu0 }
 0x100   :  { %559 = vst [vmem:[#allocation3 + $0x88] sm:$0xff] %v1018_v14  ;;  %v364_v15 = vpop.f32.mrb[17].mxu0 }
 0x101   :  { %558 = vst [vmem:[#allocation3 + $0x80] sm:$0xff] %v364_v15  ;;  %1096 = vmatprep.mubr.f32.mxu1 %v364_v15 }
 0x102   :  { %1097 = vmatmul.mubr.f32.gmra.mrb[10].mxu1 %v1018_v14 }
 0x103   :  { %v1021_v16 = vpop.f32.mrb[18].mxu0 }
 0x104   :  { %561 = vst [vmem:[#allocation3 + $0x98] sm:$0xff] %v1021_v16  ;;  %v374_v17 = vpop.f32.mrb[19].mxu0 }
 0x105   :  { %560 = vst [vmem:[#allocation3 + $0x90] sm:$0xff] %v374_v17  ;;  %1099 = vmatprep.mubr.f32.mxu1 %v374_v17 }
 0x106   :  { %1100 = vmatmul.mubr.f32.gmra.mrb[12].mxu1 %v1021_v16 }
 0x107   :  { %v1024_v18 = vpop.f32.mrb[20].mxu0 }
 0x108   :  { %563 = vst [vmem:[#allocation3 + $0xa8] sm:$0xff] %v1024_v18  ;;  %v384_v19 = vpop.f32.mrb[21].mxu0 }
 0x109   :  { %562 = vst [vmem:[#allocation3 + $0xa0] sm:$0xff] %v384_v19  ;;  %1102 = vmatprep.mubr.f32.mxu1 %v384_v19 }
 0x10a   :  { %1103 = vmatmul.mubr.f32.gmra.mrb[14].mxu1 %v1024_v18 }
 0x10b   :  { %v1027_v20 = vpop.f32.mrb[22].mxu0 }
 0x10c   :  { %565 = vst [vmem:[#allocation3 + $0xb8] sm:$0xff] %v1027_v20  ;;  %v394_v21 = vpop.f32.mrb[23].mxu0 }
 0x10d   :  { %564 = vst [vmem:[#allocation3 + $0xb0] sm:$0xff] %v394_v21  ;;  %1105 = vmatprep.mubr.f32.mxu1 %v394_v21 }
 0x10e   :  { %1106 = vmatmul.mubr.f32.gmra.mrb[16].mxu1 %v1027_v20 }
 0x10f   :  { %v1030_v22 = vpop.f32.mrb[24].mxu0 }
 0x110   :  { %567 = vst [vmem:[#allocation3 + $0xc8] sm:$0xff] %v1030_v22  ;;  %v404_v23 = vpop.f32.mrb[25].mxu0 }
 0x111   :  { %566 = vst [vmem:[#allocation3 + $0xc0] sm:$0xff] %v404_v23  ;;  %1108 = vmatprep.mubr.f32.mxu1 %v404_v23 }
 0x112   :  { %1109 = vmatmul.mubr.f32.gmra.mrb[18].mxu1 %v1030_v22 }
 0x113   :  { %v1033_v24 = vpop.f32.mrb[26].mxu0 }
 0x114   :  { %569 = vst [vmem:[#allocation3 + $0xd8] sm:$0xff] %v1033_v24  ;;  %v414_v25 = vpop.f32.mrb[27].mxu0 }
 0x115   :  { %568 = vst [vmem:[#allocation3 + $0xd0] sm:$0xff] %v414_v25  ;;  %1111 = vmatprep.mubr.f32.mxu1 %v414_v25 }
 0x116   :  { %1112 = vmatmul.mubr.f32.gmra.mrb[20].mxu1 %v1033_v24 }
 0x117   :  { %v1036_v26 = vpop.f32.mrb[28].mxu0 }
 0x118   :  { %571 = vst [vmem:[#allocation3 + $0xe8] sm:$0xff] %v1036_v26  ;;  %v424_v27 = vpop.f32.mrb[29].mxu0 }
 0x119   :  { %570 = vst [vmem:[#allocation3 + $0xe0] sm:$0xff] %v424_v27  ;;  %1114 = vmatprep.mubr.f32.mxu1 %v424_v27 }
 0x11a   :  { %1115 = vmatmul.mubr.f32.gmra.mrb[22].mxu1 %v1036_v26 }
 0x11b   :  { %v1039_v28 = vpop.f32.mrb[30].mxu0 }
 0x11c   :  { %573 = vst [vmem:[#allocation3 + $0xf8] sm:$0xff] %v1039_v28  ;;  %v434_v29 = vpop.f32.mrb[31].mxu0 }
 0x11d   :  { %572 = vst [vmem:[#allocation3 + $0xf0] sm:$0xff] %v434_v29  ;;  %1117 = vmatprep.mubr.f32.mxu1 %v434_v29 }
 0x11e   :  { %1118 = vmatmul.mubr.f32.gmra.mrb[24].mxu1 %v1039_v28 }
 0x11f   :  { %1190 = shalt.err (!%p1187_p4)
}
 0x120   :  { %s1191_s13 = scalar_lea.hbm %s1562_s3, 4096 }
 0x121   :  { %p1192_p5 = scmp.ne.s32.totalorder %s1562_s3, %s1191_s13  ;;  %p1195_p6 = scmp.lt.u32.totalorder %s1191_s13, %s1562_s3 }
 0x123   :  { %p1197_p7 = pnand %p1195_p6, %p1192_p5 }
 0x125   :  { %1200 = shalt.err (!%p1197_p7)
}
 0x126   :  { %s1204_s18 = smov 128   ;;  %s1205_s19 = smov 8   ;;  %vm815_vm1 = vcmask 15360  }
 0x127   :  { %859 = dma.vmem_to_hbm [thread:$0]  %s854_s9, 4096, %s1562_s3, [#allocation4], %s1204_s18, %s1204_s18, %s1205_s19  }
 0x1b5   :  { %v1074_v30 = vpop.f32.mrb[32].mxu0 }
 0x1b6   :  { %817 = vst.msk [vmem:[%s1563_s4 + $0x8] sm:$0xff] %vm815_vm1, %v1074_v30  ;;  %v656_v31 = vpop.f32.mrb[33].mxu0 }
 0x1b7   :  { %816 = vst.msk [vmem:[%s1563_s4] sm:$0xff] %vm815_vm1, %v656_v31 }
 0x1b9   :  { %v1077_v32 = vpop.f32.mrb[34].mxu0 }
 0x1ba   :  { %819 = vst.msk [vmem:[%s1563_s4 + $0x18] sm:$0xff] %vm815_vm1, %v1077_v32  ;;  %v666_v33 = vpop.f32.mrb[35].mxu0 }
 0x1bb   :  { %818 = vst.msk [vmem:[%s1563_s4 + $0x10] sm:$0xff] %vm815_vm1, %v666_v33 }
 0x1bd   :  { %v1080_v34 = vpop.f32.mrb[36].mxu0 }
 0x1be   :  { %821 = vst.msk [vmem:[%s1563_s4 + $0x28] sm:$0xff] %vm815_vm1, %v1080_v34  ;;  %v676_v35 = vpop.f32.mrb[37].mxu0 }
 0x1bf   :  { %820 = vst.msk [vmem:[%s1563_s4 + $0x20] sm:$0xff] %vm815_vm1, %v676_v35 }
 0x1c1   :  { %v1083_v36 = vpop.f32.mrb[0].mxu1 }
 0x1c2   :  { %823 = vst.msk [vmem:[%s1563_s4 + $0x38] sm:$0xff] %vm815_vm1, %v1083_v36  ;;  %v686_v37 = vpop.f32.mrb[1].mxu1 }
 0x1c3   :  { %822 = vst.msk [vmem:[%s1563_s4 + $0x30] sm:$0xff] %vm815_vm1, %v686_v37 }
 0x1c5   :  { %v1086_v38 = vpop.f32.mrb[2].mxu1 }
 0x1c6   :  { %825 = vst.msk [vmem:[%s1563_s4 + $0x48] sm:$0xff] %vm815_vm1, %v1086_v38  ;;  %v696_v39 = vpop.f32.mrb[3].mxu1 }
 0x1c7   :  { %824 = vst.msk [vmem:[%s1563_s4 + $0x40] sm:$0xff] %vm815_vm1, %v696_v39 }
 0x1c9   :  { %v1089_v40 = vpop.f32.mrb[4].mxu1 }
 0x1ca   :  { %827 = vst.msk [vmem:[%s1563_s4 + $0x58] sm:$0xff] %vm815_vm1, %v1089_v40  ;;  %v706_v41 = vpop.f32.mrb[5].mxu1 }
 0x1cb   :  { %826 = vst.msk [vmem:[%s1563_s4 + $0x50] sm:$0xff] %vm815_vm1, %v706_v41 }
 0x1cd   :  { %v1092_v42 = vpop.f32.mrb[6].mxu1 }
 0x1ce   :  { %829 = vst.msk [vmem:[%s1563_s4 + $0x68] sm:$0xff] %vm815_vm1, %v1092_v42  ;;  %v716_v43 = vpop.f32.mrb[7].mxu1 }
 0x1cf   :  { %828 = vst.msk [vmem:[%s1563_s4 + $0x60] sm:$0xff] %vm815_vm1, %v716_v43 }
 0x1d1   :  { %v1095_v44 = vpop.f32.mrb[8].mxu1 }
 0x1d2   :  { %831 = vst.msk [vmem:[%s1563_s4 + $0x78] sm:$0xff] %vm815_vm1, %v1095_v44  ;;  %v726_v45 = vpop.f32.mrb[9].mxu1 }
 0x1d3   :  { %830 = vst.msk [vmem:[%s1563_s4 + $0x70] sm:$0xff] %vm815_vm1, %v726_v45 }
 0x1d5   :  { %v1098_v46 = vpop.f32.mrb[10].mxu1 }
 0x1d6   :  { %833 = vst.msk [vmem:[%s1563_s4 + $0x88] sm:$0xff] %vm815_vm1, %v1098_v46  ;;  %v736_v47 = vpop.f32.mrb[11].mxu1 }
 0x1d7   :  { %832 = vst.msk [vmem:[%s1563_s4 + $0x80] sm:$0xff] %vm815_vm1, %v736_v47 }
 0x1d9   :  { %v1101_v48 = vpop.f32.mrb[12].mxu1 }
 0x1da   :  { %835 = vst.msk [vmem:[%s1563_s4 + $0x98] sm:$0xff] %vm815_vm1, %v1101_v48  ;;  %v746_v49 = vpop.f32.mrb[13].mxu1 }
 0x1db   :  { %834 = vst.msk [vmem:[%s1563_s4 + $0x90] sm:$0xff] %vm815_vm1, %v746_v49 }
 0x1dd   :  { %v1104_v50 = vpop.f32.mrb[14].mxu1 }
 0x1de   :  { %837 = vst.msk [vmem:[%s1563_s4 + $0xa8] sm:$0xff] %vm815_vm1, %v1104_v50  ;;  %v756_v51 = vpop.f32.mrb[15].mxu1 }
 0x1df   :  { %836 = vst.msk [vmem:[%s1563_s4 + $0xa0] sm:$0xff] %vm815_vm1, %v756_v51 }
 0x1e1   :  { %v1107_v52 = vpop.f32.mrb[16].mxu1 }
 0x1e2   :  { %839 = vst.msk [vmem:[%s1563_s4 + $0xb8] sm:$0xff] %vm815_vm1, %v1107_v52  ;;  %v766_v53 = vpop.f32.mrb[17].mxu1 }
 0x1e3   :  { %838 = vst.msk [vmem:[%s1563_s4 + $0xb0] sm:$0xff] %vm815_vm1, %v766_v53 }
 0x1e5   :  { %v1110_v54 = vpop.f32.mrb[18].mxu1 }
 0x1e6   :  { %841 = vst.msk [vmem:[%s1563_s4 + $0xc8] sm:$0xff] %vm815_vm1, %v1110_v54  ;;  %v776_v55 = vpop.f32.mrb[19].mxu1 }
 0x1e7   :  { %840 = vst.msk [vmem:[%s1563_s4 + $0xc0] sm:$0xff] %vm815_vm1, %v776_v55 }
 0x1e9   :  { %v1113_v56 = vpop.f32.mrb[20].mxu1 }
 0x1ea   :  { %843 = vst.msk [vmem:[%s1563_s4 + $0xd8] sm:$0xff] %vm815_vm1, %v1113_v56  ;;  %v786_v57 = vpop.f32.mrb[21].mxu1 }
 0x1eb   :  { %842 = vst.msk [vmem:[%s1563_s4 + $0xd0] sm:$0xff] %vm815_vm1, %v786_v57 }
 0x1ed   :  { %v1116_v58 = vpop.f32.mrb[22].mxu1 }
 0x1ee   :  { %845 = vst.msk [vmem:[%s1563_s4 + $0xe8] sm:$0xff] %vm815_vm1, %v1116_v58  ;;  %v796_v59 = vpop.f32.mrb[23].mxu1 }
 0x1ef   :  { %844 = vst.msk [vmem:[%s1563_s4 + $0xe0] sm:$0xff] %vm815_vm1, %v796_v59 }
 0x1f1   :  { %v1119_v60 = vpop.f32.mrb[24].mxu1 }
 0x1f2   :  { %847 = vst.msk [vmem:[%s1563_s4 + $0xf8] sm:$0xff] %vm815_vm1, %v1119_v60  ;;  %v806_v61 = vpop.f32.mrb[25].mxu1 }
 0x1f3   :  { %846 = vst.msk [vmem:[%s1563_s4 + $0xf0] sm:$0xff] %vm815_vm1, %v806_v61 }
 0x1f4   :  { %1201 = dma.done.wait [#allocation4], 4096  }
 0x1f5   :  { %1202 = vsyncadd [#allocation4], 4294963200 }
 0x1f6   :  { %867 = vsyncpa [#allocation4], 1 }

</bundles_post_ra>
